<compile_context>
chip_gen: v7x
topology: tpu7x:2x2x1
jax: 0.10.0
libtpu: 0.0.40
codegen_flags: <defaults>
</compile_context>

<pallas_src>
import functools

import jax
import jax.numpy as jnp
from jax.experimental import pallas as pl
from jax.experimental.pallas import tpu as pltpu

_LANES = 128
# Per-buffer VMEM budget for one input block (double-buffered by Pallas).
_MAX_BLOCK_BYTES = 2 * 1024 * 1024


def _sq_mean_kernel(x_ref, o_ref, acc_ref, *, inv_count, block_rows,
                    valid_rows, mask_last):
    """Accumulate sum(x^2) per lane across grid steps; emit mean at the end."""
    i = pl.program_id(0)
    last = pl.num_programs(0) - 1

    @pl.when(i == 0)
    def _():
        acc_ref[...] = jnp.zeros_like(acc_ref)

    x = x_ref[...].astype(jnp.float32)

    if mask_last:
        # Array rows don't divide block_rows: the trailing block reads
        # unspecified padding, so zero it — but only on the final step.
        @pl.when(i != last)
        def _():
            acc_ref[...] += jnp.sum(x * x, axis=0, keepdims=True)

        @pl.when(i == last)
        def _():
            row = jax.lax.broadcasted_iota(jnp.int32, x.shape, 0) + i * block_rows
            xm = jnp.where(row < valid_rows, x, 0.0)
            acc_ref[...] += jnp.sum(xm * xm, axis=0, keepdims=True)
    else:
        acc_ref[...] += jnp.sum(x * x, axis=0, keepdims=True)

    @pl.when(i == last)
    def _():
        # Single cross-lane (XLU) reduce, exactly once per call.
        total = jnp.sum(acc_ref[...], axis=1, keepdims=True)  # (1, 1)
        o_ref[...] = total * inv_count


def deep_dream(activation: jax.Array,
               max_block_bytes: int = _MAX_BLOCK_BYTES) -> jax.Array:
    """Returns mean(activation ** 2) as a scalar f32, computed in Pallas."""
    n_elems = int(activation.size)
    itemsize = int(activation.dtype.itemsize)
    # Packed sublane tile: (8,128) f32, (16,128) bf16, (32,128) int8/fp8.
    row_align = max(8, 32 // itemsize)

    flat = jnp.ravel(activation)  # metadata-only reshape for contiguous input

    # Lane padding: only when the element count is not a multiple of 128.
    # TODO(synk): this rare ragged-lane case costs one full HBM copy (jnp.pad).
    lane_pad = (-n_elems) % _LANES
    if lane_pad:
        flat = jnp.pad(flat, (0, lane_pad))
    rows = flat.size // _LANES
    x2d = flat.reshape(rows, _LANES)

    raw_rows = max_block_bytes // (_LANES * itemsize)
    max_block_rows = max(row_align, (raw_rows // row_align) * row_align)

    if rows <= max_block_rows:
        # Single full-slab block: block dim == full array dim is always legal,
        # so no row padding, alignment, or masking is needed.
        block_rows = rows
        mask_last = False
    else:
        block_rows = max_block_rows           # multiple of the packed sublane tile
        mask_last = (rows % block_rows) != 0  # trailing partial block

    n_blocks = pl.cdiv(rows, block_rows)

    kernel = functools.partial(
        _sq_mean_kernel,
        inv_count=1.0 / float(n_elems),
        block_rows=block_rows,
        valid_rows=rows,
        mask_last=mask_last,
    )

    out = pl.pallas_call(
        kernel,
        out_shape=jax.ShapeDtypeStruct((1, 1), jnp.float32),
        grid_spec=pltpu.PrefetchScalarGridSpec(
            num_scalar_prefetch=0,
            grid=(n_blocks,),
            in_specs=[pl.BlockSpec((block_rows, _LANES), lambda i: (i, 0))],
            out_specs=pl.BlockSpec((1, 1), lambda i: (0, 0)),
            scratch_shapes=[pltpu.VMEM((1, _LANES), jnp.float32)],
        ),
        compiler_params=pltpu.CompilerParams(
            dimension_semantics=("arbitrary",),  # sequential reduction axis
        ),
    )(x2d)

    return out[0, 0]


if __name__ == "__main__":
    key = jax.random.PRNGKey(0)
    k1, k2, k3 = jax.random.split(key, 3)

    # 1) Small NCHW conv activation (single full-slab block path).
    x = jax.random.normal(k1, (2, 4, 16, 16), dtype=jnp.float32)
    res = deep_dream(x)
    jax.block_until_ready(res)
    ref = jnp.mean(jnp.square(x))
    assert jnp.allclose(res, ref, rtol=1e-5, atol=1e-6), (res, ref)

    # 2) Ragged element count (not a multiple of 128) with a tiny block budget
    #    to exercise lane padding + multi-block grid + masked trailing block.
    y = jax.random.normal(k2, (1, 8, 17, 23), dtype=jnp.float32)
    res2 = deep_dream(y, max_block_bytes=8 * 1024)
    jax.block_until_ready(res2)
    ref2 = jnp.mean(jnp.square(y))
    assert jnp.allclose(res2, ref2, rtol=1e-5, atol=1e-6), (res2, ref2)

    # 3) bf16 activation: native-dtype feed, multi-block + masked last block.
    z = jax.random.normal(k3, (1, 16, 24, 24), dtype=jnp.bfloat16)
    res3 = deep_dream(z, max_block_bytes=16 * 1024)
    jax.block_until_ready(res3)
    ref3 = jnp.mean(jnp.square(z.astype(jnp.float32)))
    assert jnp.allclose(res3, ref3, rtol=1e-4, atol=1e-6), (res3, ref3)

    print("KERNEL_OK")
</pallas_src>

<mosaic_0001>
module attributes {stable_mosaic.version = 11 : i64} {
  func.func @_sq_mean_kernel(%arg0: i32, %arg1: memref<16x128xf32, #tpu.memory_space<vmem>>, %arg2: memref<1x1xf32, #tpu.memory_space<vmem>>, %arg3: memref<1x128xf32, #tpu.memory_space<vmem>>) attributes {dimension_semantics = [#tpu.dimension_semantics<arbitrary>], iteration_bounds = array<i64: 1>, scalar_prefetch = 0 : i64, scratch_operands = 1 : i64, tpu.core_type = #tpu.core_type<tc>, window_params = [{transform_indices = @transform_0, window_bounds = array<i64: 16, 128>}, {pipeline_mode = #tpu.pipeline_mode<synchronous>, transform_indices = @transform_1, window_bounds = array<i64: 1, 1>}]} {
    %c0_i32 = arith.constant 0 : i32
    %0 = arith.cmpi eq, %arg0, %c0_i32 : i32
    %1 = arith.extui %0 : i1 to i32
    %c0_i32_0 = arith.constant 0 : i32
    %2 = arith.cmpi ne, %1, %c0_i32_0 : i32
    scf.if %2 {
      %cst_8 = arith.constant 0.000000e+00 : f32
      %13 = vector.broadcast %cst_8 : f32 to vector<1x128xf32>
      %c0_9 = arith.constant 0 : index
      %c0_10 = arith.constant 0 : index
      %14 = vector.load %arg3[%c0_9, %c0_10] : memref<1x128xf32, #tpu.memory_space<vmem>>, vector<1x128xf32>
      tpu.vector_store %arg3[%c0_9, %c0_10], %13 {strides = array<i32>} : memref<1x128xf32, #tpu.memory_space<vmem>>, vector<1x128xf32>,
    } else {
    }
    %c0 = arith.constant 0 : index
    %c0_1 = arith.constant 0 : index
    %3 = vector.load %arg1[%c0, %c0_1] : memref<16x128xf32, #tpu.memory_space<vmem>>, vector<16x128xf32>
    %c0_2 = arith.constant 0 : index
    %c0_3 = arith.constant 0 : index
    %4 = vector.load %arg3[%c0_2, %c0_3] : memref<1x128xf32, #tpu.memory_space<vmem>>, vector<1x128xf32>
    %5 = arith.mulf %3, %3 : vector<16x128xf32>
    %cst = arith.constant dense<0.000000e+00> : vector<128xf32>
    %6 = vector.multi_reduction <add>, %5, %cst [0] : vector<16x128xf32> to vector<128xf32>
    %7 = vector.shape_cast %6 : vector<128xf32> to vector<1x128xf32>
    %8 = arith.addf %4, %7 : vector<1x128xf32>
    %c0_4 = arith.constant 0 : index
    %c0_5 = arith.constant 0 : index
    %9 = vector.load %arg3[%c0_4, %c0_5] : memref<1x128xf32, #tpu.memory_space<vmem>>, vector<1x128xf32>
    tpu.vector_store %arg3[%c0_4, %c0_5], %8 {strides = array<i32>} : memref<1x128xf32, #tpu.memory_space<vmem>>, vector<1x128xf32>,
    %c0_i32_6 = arith.constant 0 : i32
    %10 = arith.cmpi eq, %arg0, %c0_i32_6 : i32
    %11 = arith.extui %10 : i1 to i32
    %c0_i32_7 = arith.constant 0 : i32
    %12 = arith.cmpi ne, %11, %c0_i32_7 : i32
    scf.if %12 {
      %c0_8 = arith.constant 0 : index
      %c0_9 = arith.constant 0 : index
      %13 = vector.load %arg3[%c0_8, %c0_9] : memref<1x128xf32, #tpu.memory_space<vmem>>, vector<1x128xf32>
      %cst_10 = arith.constant dense<0.000000e+00> : vector<1xf32>
      %14 = vector.multi_reduction <add>, %13, %cst_10 [1] : vector<1x128xf32> to vector<1xf32>
      %15 = vector.shape_cast %14 : vector<1xf32> to vector<1x1xf32>
      %cst_11 = arith.constant 4.8828125E-4 : f32
      %16 = vector.broadcast %cst_11 : f32 to vector<1x1xf32>
      %17 = arith.mulf %15, %16 : vector<1x1xf32>
      %c0_12 = arith.constant 0 : index
      %c0_13 = arith.constant 0 : index
      %18 = vector.load %arg2[%c0_12, %c0_13] : memref<1x1xf32, #tpu.memory_space<vmem>>, vector<1x1xf32>
      tpu.vector_store %arg2[%c0_12, %c0_13], %17 {strides = array<i32>} : memref<1x1xf32, #tpu.memory_space<vmem>>, vector<1x1xf32>,
    } else {
    }
    return
  }
  func.func @transform_0(%arg0: i32) -> (i32, i32) {
    %c0_i32 = arith.constant 0 : i32
    %c0_i32_0 = arith.constant 0 : i32
    return %arg0, %c0_i32 : i32, i32
  }
  func.func @transform_1(%arg0: i32) -> (i32, i32) {
    %c0_i32 = arith.constant 0 : i32
    %c0_i32_0 = arith.constant 0 : i32
    %c0_i32_1 = arith.constant 0 : i32
    return %c0_i32, %c0_i32_0 : i32, i32
  }
}

</mosaic_0001>

<bundles_post_ra>
// kernel: tpu_custom_call.1
= control target key start
LH: loop header
LB: loop body
LE: loop exit
PB: predicated region body
PF: predicated region fallthrough
CT: control target
= control target key end

     0   :  { %6 = vsyncpa [#allocation4], 0  ;;  %s160_s0 = inlined_call_operand.hbm [shape: f32[16,128], index: 0, kind: input, shape index: {}]   ;;  %s161_s1 = inlined_call_operand.hbm [shape: f32[1,1], index: 1, kind: output, shape index: {}]  }
   0x1   :  { %7 = vsyncpa [#allocation5], 0  ;;  %s121_s6 = smov [#allocation3]   ;;  %s73_s10 = scalar_lea.hbm %s160_s0, 256 }
   0x2   :  { %s13_s7 = sshll.u32 %s121_s6, 4  ;;  %p74_p0 = scmp.ne.s32.totalorder %s160_s0, %s73_s10  ;;  %s14_s7 = int_to_ptr.vmem [resolvable:$true] %s13_s7 }
   0x3   :  { %p77_p1 = scmp.lt.u32.totalorder %s73_s10, %s160_s0 }
   0x5   :  { %p79_p2 = pnand %p77_p1, %p74_p0 }
   0x7   :  { %82 = shalt.err (!%p79_p2)
}
   0x8   :  { %s83_s15 = scalar_lea.vmem %s14_s7, 256  ;;  %p88_p4 = scmp.lt.s32.totalorder %s14_s7, %s14_s7 }
   0x9   :  { %p84_p3 = scmp.ne.s32.totalorder %s14_s7, %s83_s15  ;;  %p89_p5 = scmp.lt.s32.totalorder %s83_s15, %s83_s15 }
   0xb   :  { %p90_p6 = por %p89_p5, %p88_p4 }
   0xd   :  { %p91_p7 = pnand %p90_p6, %p84_p3 }
   0xf   :  { %94 = shalt.err (!%p91_p7)
}
  0x10   :  { %s122_s16 = smov 128   ;;  %s123_s17 = smov 8  }
  0x11   :  { %19 = dma.hbm_to_vmem [thread:$0]  %s160_s0, 256, %s14_s7, [#allocation4], %s122_s16, %s122_s16, %s123_s17  }
  0x12   :  { %117 = dma.done.wait [#allocation4], 256  }
  0x13   :  { %118 = vsyncadd [#allocation4], 4294967040  ;;  %v124_v0 = vmov 0.0   ;;  %v28_v1 = vld [vmem:[#allocation3] sm:$0xff]  ;;  %v29_v2 = vld [vmem:[#allocation3 + $0x8] sm:$0xff]  ;;  %vm46_vm0 = vcmask 1040384  }
  0x14   :  { %27 = vst [vmem:[#allocation2] sm:$0x1] %v124_v0  ;;  %v31_v3 = vmul.f32 %v28_v1, %v28_v1  ;;  %v32_v4 = vmul.f32 %v29_v2, %v29_v2  ;;  %s125_s0 = smov [#allocation6]   ;;  %vm51_vm1 = vcmask 0  }
  0x15   :  { %s59_s20 = sshll.u32 %s125_s0, 4  ;;  %s60_s20 = int_to_ptr.vmem [resolvable:$true] %s59_s20 }
  0x16   :  { %v33_v5 = vadd.f32 %v32_v4, %v31_v3  ;;  %s95_s21 = scalar_lea.vmem %s60_s20, 16  ;;  %s99_s22 = scalar_lea.vmem %s60_s20, 32 }
  0x17   :  { %p96_p8 = scmp.ne.s32.totalorder %s60_s20, %s95_s21  ;;  %p100_p9 = scmp.lt.s32.totalorder %s60_s20, %s60_s20 }
  0x18   :  { %v34_v6 = vrot.slane %v33_v5, 4  ;;  %p101_p10 = scmp.lt.s32.totalorder %s99_s22, %s95_s21 }
  0x1a   :  { %v35_v7 = vadd.f32 %v34_v6, %v33_v5  ;;  %p102_p11 = por %p101_p10, %p100_p9 }
  0x1b   :  { %v30_v11 = vld [vmem:[#allocation2] sm:$0x1] }
  0x1c   :  { %v36_v8 = vrot.slane %v35_v7, 2  ;;  %p103_p12 = pnand %p102_p11, %p96_p8 }
  0x1e   :  { %v37_v9 = vadd.f32 %v36_v8, %v35_v7 }
  0x20   :  { %v38_v10 = vrot.slane %v37_v9, 1 }
  0x22   :  { %v39_v12 = vadd.f32 %v38_v10, %v37_v9 }
  0x24   :  { %v40_v13 = vadd.f32 %v39_v12, %v30_v11 }
  0x26   :  { %41 = vst [vmem:[#allocation2] sm:$0x1] %v40_v13 }
  0x2d   :  { %v45_v14 = vld [vmem:[#allocation2] sm:$0x1] }
  0x2e   :  { %v47_v15 = vsel %vm46_vm0, %v45_v14, 0.0 }
  0x2f   :  { %48 = vadd.xlane.f32.xlu0 %v47_v15 }
  0xbc   :  { %v49_v16 = vpop.xlane.xlu0 %48 }
  0xbd   :  { %v50_v17 = vmul.f32 0.00048828125, %v49_v16 }
  0xbf   :  { %52 = vst.msk [vmem:[#allocation6] sm:$0x1] %vm51_vm1, %v50_v17 }
  0xc0   :  { %106 = shalt.err (!%p103_p12)
}
  0xc1   :  { %s107_s25 = scalar_lea.hbm %s161_s1, 16 }
  0xc2   :  { %p108_p13 = scmp.ne.s32.totalorder %s161_s1, %s107_s25  ;;  %p111_p0 = scmp.lt.u32.totalorder %s107_s25, %s161_s1 }
  0xc4   :  { %p113_p1 = pnand %p111_p0, %p108_p13 }
  0xc6   :  { %116 = shalt.err (!%p113_p1)
}
  0xc7   :  { %62 = dma.vmem_to_hbm [thread:$0]  %s60_s20, 16, %s161_s1, [#allocation5]  }
  0xc8   :  { %119 = dma.done.wait [#allocation5], 16  }
  0xc9   :  { %120 = vsyncadd [#allocation5], 4294967280 }
  0xca   :  { %66 = vsyncpa [#allocation4], 1 }
  0xcb   :  { %67 = vsyncpa [#allocation5], 1 }

</bundles_post_ra>
